<compile_context>
chip_gen: v5e
topology: v5e:2x2
jax: 0.10.0
libtpu: 0.0.40
codegen_flags: <defaults>
</compile_context>

<pallas_src>
import functools

import jax
import jax.numpy as jnp
from jax.experimental import pallas as pl
from jax.experimental.pallas import tpu as pltpu

LANES = 128
SUBLANES = 8
CHUNK = SUBLANES * LANES            # 1024 elements per (8, 128) group
MAX_BLOCK_GROUPS = 256              # (256, 8, 128) f32 = 1 MiB per input block


def _dice_sums_kernel(x_ref, y_ref, o_ref, acc_xy, acc_x, acc_y,
                      *, valid_groups, needs_mask):
    i = pl.program_id(0)

    @pl.when(i == 0)
    def _init():
        acc_xy[...] = jnp.zeros_like(acc_xy)
        acc_x[...] = jnp.zeros_like(acc_x)
        acc_y[...] = jnp.zeros_like(acc_y)

    x = x_ref[...].astype(jnp.float32)
    y = y_ref[...].astype(jnp.float32)

    if needs_mask:
        # The final block may overrun the array; mask out-of-range groups so
        # the (undefined) overrun data never reaches the sums.
        bg = x.shape[0]
        grp = i * bg + jax.lax.broadcasted_iota(jnp.int32, x.shape, 0)
        valid = grp < valid_groups
        x = jnp.where(valid, x, 0.0)
        y = jnp.where(valid, y, 0.0)

    # Fold the block onto (8, 128) accumulators: pure elementwise VPU adds.
    acc_xy[...] += jnp.sum(x * y, axis=0)
    acc_x[...] += jnp.sum(x, axis=0)
    acc_y[...] += jnp.sum(y, axis=0)

    @pl.when(i == pl.num_programs(0) - 1)
    def _finalize():
        # Single cross-lane/sublane reduction, only at the very end.
        o_ref[0, 0] = jnp.sum(acc_xy[...])
        o_ref[0, 1] = jnp.sum(acc_x[...])
        o_ref[0, 2] = jnp.sum(acc_y[...])


def dice_loss(inputs, targets, smooth=1e-5):
    x = jnp.reshape(inputs, (-1,))
    y = jnp.reshape(targets, (-1,))
    n = x.shape[0]

    # Pad only up to the (8, 128) tile granularity; zero padding leaves all
    # three sums unchanged.  Sizes that are already a multiple of 1024 take a
    # copy-free reshape (no extra HBM pass).
    rem = n % CHUNK
    if rem:
        # TODO(synk): mask the ragged tail in-kernel as well so this HBM pad
        # copy is avoided for non-multiple-of-1024 sizes.
        pad = CHUNK - rem
        x = jnp.pad(x, (0, pad))
        y = jnp.pad(y, (0, pad))

    g = x.shape[0] // CHUNK
    x3 = x.reshape(g, SUBLANES, LANES)
    y3 = y.reshape(g, SUBLANES, LANES)

    bg = min(MAX_BLOCK_GROUPS, g)
    grid = (g + bg - 1) // bg
    needs_mask = (g % bg) != 0

    kernel = functools.partial(
        _dice_sums_kernel, valid_groups=g, needs_mask=needs_mask)

    sums = pl.pallas_call(
        kernel,
        out_shape=jax.ShapeDtypeStruct((1, 3), jnp.float32),
        grid_spec=pltpu.PrefetchScalarGridSpec(
            num_scalar_prefetch=0,
            grid=(grid,),
            in_specs=[
                pl.BlockSpec((bg, SUBLANES, LANES), lambda i: (i, 0, 0)),
                pl.BlockSpec((bg, SUBLANES, LANES), lambda i: (i, 0, 0)),
            ],
            out_specs=pl.BlockSpec((1, 3), lambda i: (0, 0),
                                   memory_space=pltpu.SMEM),
            scratch_shapes=[
                pltpu.VMEM((SUBLANES, LANES), jnp.float32),
                pltpu.VMEM((SUBLANES, LANES), jnp.float32),
                pltpu.VMEM((SUBLANES, LANES), jnp.float32),
            ],
        ),
        compiler_params=pltpu.CompilerParams(
            dimension_semantics=("arbitrary",),
        ),
    )(x3, y3)

    inter = sums[0, 0]
    sum_x = sums[0, 1]
    sum_y = sums[0, 2]
    dice = (2.0 * inter + smooth) / (sum_x + sum_y + smooth)
    return 1.0 - dice


def dice_loss_ref(inputs, targets, smooth=1e-5):
    x = jnp.reshape(inputs, (-1,)).astype(jnp.float32)
    y = jnp.reshape(targets, (-1,)).astype(jnp.float32)
    inter = jnp.sum(x * y)
    dice = (2.0 * inter + smooth) / (jnp.sum(x) + jnp.sum(y) + smooth)
    return 1.0 - dice


if __name__ == "__main__":
    key = jax.random.PRNGKey(0)
    k1, k2, k3, k4 = jax.random.split(key, 4)

    # Segmentation-style NCHW inputs: (2, 4, 16, 16) = 2048 elems (aligned).
    inputs = jax.nn.sigmoid(jax.random.normal(k1, (2, 4, 16, 16), jnp.float32))
    targets = (jax.random.uniform(k2, (2, 4, 16, 16)) > 0.5).astype(jnp.float32)

    loss = jax.block_until_ready(dice_loss(inputs, targets))
    ref = jax.block_until_ready(dice_loss_ref(inputs, targets))
    assert jnp.allclose(loss, ref, rtol=1e-5, atol=1e-6), (loss, ref)

    # Ragged size (546 elems) exercising the tile-granularity pad path.
    inputs2 = jax.nn.sigmoid(jax.random.normal(k3, (2, 3, 13, 7), jnp.float32))
    targets2 = (jax.random.uniform(k4, (2, 3, 13, 7)) > 0.5).astype(jnp.float32)

    loss2 = jax.block_until_ready(dice_loss(inputs2, targets2))
    ref2 = jax.block_until_ready(dice_loss_ref(inputs2, targets2))
    assert jnp.allclose(loss2, ref2, rtol=1e-5, atol=1e-6), (loss2, ref2)

    print("KERNEL_OK")
</pallas_src>

<mosaic_0001>
module attributes {stable_mosaic.version = 11 : i64} {
  func.func @_dice_sums_kernel(%arg0: i32, %arg1: memref<2x8x128xf32, #tpu.memory_space<vmem>>, %arg2: memref<2x8x128xf32, #tpu.memory_space<vmem>>, %arg3: memref<1x3xf32, #tpu.memory_space<smem>>, %arg4: memref<8x128xf32, #tpu.memory_space<vmem>>, %arg5: memref<8x128xf32, #tpu.memory_space<vmem>>, %arg6: memref<8x128xf32, #tpu.memory_space<vmem>>) attributes {dimension_semantics = [#tpu.dimension_semantics<arbitrary>], iteration_bounds = array<i64: 1>, scalar_prefetch = 0 : i64, scratch_operands = 3 : i64, tpu.core_type = #tpu.core_type<tc>, window_params = [{transform_indices = @transform_0, window_bounds = array<i64: 2, 8, 128>}, {transform_indices = @transform_1, window_bounds = array<i64: 2, 8, 128>}, {transform_indices = @transform_2, window_bounds = array<i64: 1, 3>}]} {
    %c0_i32 = arith.constant 0 : i32
    %0 = arith.cmpi eq, %arg0, %c0_i32 : i32
    %1 = arith.extui %0 : i1 to i32
    %c0_i32_0 = arith.constant 0 : i32
    %2 = arith.cmpi ne, %1, %c0_i32_0 : i32
    scf.if %2 {
      %cst_22 = arith.constant 0.000000e+00 : f32
      %21 = vector.broadcast %cst_22 : f32 to vector<8x128xf32>
      %c0_23 = arith.constant 0 : index
      %c0_24 = arith.constant 0 : index
      %22 = vector.load %arg4[%c0_23, %c0_24] : memref<8x128xf32, #tpu.memory_space<vmem>>, vector<8x128xf32>
      tpu.vector_store %arg4[%c0_23, %c0_24], %21 {strides = array<i32>} : memref<8x128xf32, #tpu.memory_space<vmem>>, vector<8x128xf32>,
      %cst_25 = arith.constant 0.000000e+00 : f32
      %23 = vector.broadcast %cst_25 : f32 to vector<8x128xf32>
      %c0_26 = arith.constant 0 : index
      %c0_27 = arith.constant 0 : index
      %24 = vector.load %arg5[%c0_26, %c0_27] : memref<8x128xf32, #tpu.memory_space<vmem>>, vector<8x128xf32>
      tpu.vector_store %arg5[%c0_26, %c0_27], %23 {strides = array<i32>} : memref<8x128xf32, #tpu.memory_space<vmem>>, vector<8x128xf32>,
      %cst_28 = arith.constant 0.000000e+00 : f32
      %25 = vector.broadcast %cst_28 : f32 to vector<8x128xf32>
      %c0_29 = arith.constant 0 : index
      %c0_30 = arith.constant 0 : index
      %26 = vector.load %arg6[%c0_29, %c0_30] : memref<8x128xf32, #tpu.memory_space<vmem>>, vector<8x128xf32>
      tpu.vector_store %arg6[%c0_29, %c0_30], %25 {strides = array<i32>} : memref<8x128xf32, #tpu.memory_space<vmem>>, vector<8x128xf32>,
    } else {
    }
    %c0 = arith.constant 0 : index
    %c0_1 = arith.constant 0 : index
    %c0_2 = arith.constant 0 : index
    %3 = vector.load %arg1[%c0, %c0_1, %c0_2] : memref<2x8x128xf32, #tpu.memory_space<vmem>>, vector<2x8x128xf32>
    %c0_3 = arith.constant 0 : index
    %c0_4 = arith.constant 0 : index
    %c0_5 = arith.constant 0 : index
    %4 = vector.load %arg2[%c0_3, %c0_4, %c0_5] : memref<2x8x128xf32, #tpu.memory_space<vmem>>, vector<2x8x128xf32>
    %c0_6 = arith.constant 0 : index
    %c0_7 = arith.constant 0 : index
    %5 = vector.load %arg4[%c0_6, %c0_7] : memref<8x128xf32, #tpu.memory_space<vmem>>, vector<8x128xf32>
    %6 = arith.mulf %3, %4 : vector<2x8x128xf32>
    %cst = arith.constant dense<0.000000e+00> : vector<8x128xf32>
    %7 = vector.multi_reduction <add>, %6, %cst [0] : vector<2x8x128xf32> to vector<8x128xf32>
    %8 = arith.addf %5, %7 : vector<8x128xf32>
    %c0_8 = arith.constant 0 : index
    %c0_9 = arith.constant 0 : index
    %9 = vector.load %arg4[%c0_8, %c0_9] : memref<8x128xf32, #tpu.memory_space<vmem>>, vector<8x128xf32>
    tpu.vector_store %arg4[%c0_8, %c0_9], %8 {strides = array<i32>} : memref<8x128xf32, #tpu.memory_space<vmem>>, vector<8x128xf32>,
    %c0_10 = arith.constant 0 : index
    %c0_11 = arith.constant 0 : index
    %10 = vector.load %arg5[%c0_10, %c0_11] : memref<8x128xf32, #tpu.memory_space<vmem>>, vector<8x128xf32>
    %cst_12 = arith.constant dense<0.000000e+00> : vector<8x128xf32>
    %11 = vector.multi_reduction <add>, %3, %cst_12 [0] : vector<2x8x128xf32> to vector<8x128xf32>
    %12 = arith.addf %10, %11 : vector<8x128xf32>
    %c0_13 = arith.constant 0 : index
    %c0_14 = arith.constant 0 : index
    %13 = vector.load %arg5[%c0_13, %c0_14] : memref<8x128xf32, #tpu.memory_space<vmem>>, vector<8x128xf32>
    tpu.vector_store %arg5[%c0_13, %c0_14], %12 {strides = array<i32>} : memref<8x128xf32, #tpu.memory_space<vmem>>, vector<8x128xf32>,
    %c0_15 = arith.constant 0 : index
    %c0_16 = arith.constant 0 : index
    %14 = vector.load %arg6[%c0_15, %c0_16] : memref<8x128xf32, #tpu.memory_space<vmem>>, vector<8x128xf32>
    %cst_17 = arith.constant dense<0.000000e+00> : vector<8x128xf32>
    %15 = vector.multi_reduction <add>, %4, %cst_17 [0] : vector<2x8x128xf32> to vector<8x128xf32>
    %16 = arith.addf %14, %15 : vector<8x128xf32>
    %c0_18 = arith.constant 0 : index
    %c0_19 = arith.constant 0 : index
    %17 = vector.load %arg6[%c0_18, %c0_19] : memref<8x128xf32, #tpu.memory_space<vmem>>, vector<8x128xf32>
    tpu.vector_store %arg6[%c0_18, %c0_19], %16 {strides = array<i32>} : memref<8x128xf32, #tpu.memory_space<vmem>>, vector<8x128xf32>,
    %c0_i32_20 = arith.constant 0 : i32
    %18 = arith.cmpi eq, %arg0, %c0_i32_20 : i32
    %19 = arith.extui %18 : i1 to i32
    %c0_i32_21 = arith.constant 0 : i32
    %20 = arith.cmpi ne, %19, %c0_i32_21 : i32
    scf.if %20 {
      %c0_22 = arith.constant 0 : index
      %c0_23 = arith.constant 0 : index
      %21 = vector.load %arg4[%c0_22, %c0_23] : memref<8x128xf32, #tpu.memory_space<vmem>>, vector<8x128xf32>
      %22 = vector.shape_cast %21 : vector<8x128xf32> to vector<1x8x128xf32>
      %cst_24 = arith.constant dense<0.000000e+00> : vector<1xf32>
      %23 = vector.multi_reduction <add>, %22, %cst_24 [1, 2] : vector<1x8x128xf32> to vector<1xf32>
      %24 = vector.shape_cast %23 : vector<1xf32> to vector<1x1x1xf32>
      %25 = vector.extract %24[0, 0, 0] : f32 from vector<1x1x1xf32>
      %c0_25 = arith.constant 0 : index
      %c0_26 = arith.constant 0 : index
      %26 = memref.load %arg3[%c0_25, %c0_26] : memref<1x3xf32, #tpu.memory_space<smem>>
      memref.store %25, %arg3[%c0_25, %c0_26] : memref<1x3xf32, #tpu.memory_space<smem>>
      %c0_27 = arith.constant 0 : index
      %c0_28 = arith.constant 0 : index
      %27 = vector.load %arg5[%c0_27, %c0_28] : memref<8x128xf32, #tpu.memory_space<vmem>>, vector<8x128xf32>
      %28 = vector.shape_cast %27 : vector<8x128xf32> to vector<1x8x128xf32>
      %cst_29 = arith.constant dense<0.000000e+00> : vector<1xf32>
      %29 = vector.multi_reduction <add>, %28, %cst_29 [1, 2] : vector<1x8x128xf32> to vector<1xf32>
      %30 = vector.shape_cast %29 : vector<1xf32> to vector<1x1x1xf32>
      %31 = vector.extract %30[0, 0, 0] : f32 from vector<1x1x1xf32>
      %c0_30 = arith.constant 0 : index
      %c1 = arith.constant 1 : index
      %32 = memref.load %arg3[%c0_30, %c1] : memref<1x3xf32, #tpu.memory_space<smem>>
      memref.store %31, %arg3[%c0_30, %c1] : memref<1x3xf32, #tpu.memory_space<smem>>
      %c0_31 = arith.constant 0 : index
      %c0_32 = arith.constant 0 : index
      %33 = vector.load %arg6[%c0_31, %c0_32] : memref<8x128xf32, #tpu.memory_space<vmem>>, vector<8x128xf32>
      %34 = vector.shape_cast %33 : vector<8x128xf32> to vector<1x8x128xf32>
      %cst_33 = arith.constant dense<0.000000e+00> : vector<1xf32>
      %35 = vector.multi_reduction <add>, %34, %cst_33 [1, 2] : vector<1x8x128xf32> to vector<1xf32>
      %36 = vector.shape_cast %35 : vector<1xf32> to vector<1x1x1xf32>
      %37 = vector.extract %36[0, 0, 0] : f32 from vector<1x1x1xf32>
      %c0_34 = arith.constant 0 : index
      %c2 = arith.constant 2 : index
      %38 = memref.load %arg3[%c0_34, %c2] : memref<1x3xf32, #tpu.memory_space<smem>>
      memref.store %37, %arg3[%c0_34, %c2] : memref<1x3xf32, #tpu.memory_space<smem>>
    } else {
    }
    return
  }
  func.func @transform_0(%arg0: i32) -> (i32, i32, i32) {
    %c0_i32 = arith.constant 0 : i32
    %c0_i32_0 = arith.constant 0 : i32
    %c0_i32_1 = arith.constant 0 : i32
    return %arg0, %c0_i32, %c0_i32_0 : i32, i32, i32
  }
  func.func @transform_1(%arg0: i32) -> (i32, i32, i32) {
    %c0_i32 = arith.constant 0 : i32
    %c0_i32_0 = arith.constant 0 : i32
    %c0_i32_1 = arith.constant 0 : i32
    return %arg0, %c0_i32, %c0_i32_0 : i32, i32, i32
  }
  func.func @transform_2(%arg0: i32) -> (i32, i32) {
    %c0_i32 = arith.constant 0 : i32
    %c0_i32_0 = arith.constant 0 : i32
    %c0_i32_1 = arith.constant 0 : i32
    return %c0_i32, %c0_i32_0 : i32, i32
  }
}

</mosaic_0001>

<bundles_post_ra>
// kernel: tpu_custom_call.1
= control target key start
LH: loop header
LB: loop body
LE: loop exit
PB: predicated region body
PF: predicated region fallthrough
CT: control target
= control target key end

     0   :  { %7 = vsyncpa [#allocation6], 0  ;;  %s231_s0 = inlined_call_operand.hbm [shape: f32[2,8,128], index: 0, kind: input, shape index: {}]   ;;  %s232_s1 = inlined_call_operand.hbm [shape: f32[2,8,128], index: 1, kind: input, shape index: {}]   ;;  %s233_s2 = inlined_call_operand.hbm [shape: f32[1,3], index: 2, kind: output, shape index: {}]  }
   0x1   :  { %8 = vsyncpa [#allocation9], 0 }
   0x2   :  { %9 = vsyncpa [#allocation7], 0  ;;  %s14_s11 = sshll.u32 %s231_s0, 4  ;;  %s202_s12 = smov [#allocation5]   ;;  %s15_s11 = int_to_ptr.hbm [resolvable:$true] %s14_s11 }
   0x3   :  { %s16_s13 = sshll.u32 %s202_s12, 4  ;;  %s27_s16 = sshll.u32 %s232_s1, 4  ;;  %s17_s13 = int_to_ptr.vmem [resolvable:$true] %s16_s13  ;;  %s28_s16 = int_to_ptr.hbm [resolvable:$true] %s27_s16 }
   0x4   :  { %s203_s17 = smov 128   ;;  %s204_s18 = smov 8  }
   0x5   :  { %22 = dma.hbm_to_vmem [thread:$0]  %s15_s11, 256, %s17_s13, [#allocation6], %s203_s17, %s203_s17, %s204_s18  }
   0x6   :  { %s205_s19 = smov [#allocation8]  }
   0x7   :  { %s29_s20 = sshll.u32 %s205_s19, 4  ;;  %s30_s20 = int_to_ptr.vmem [resolvable:$true] %s29_s20 }
   0x8   :  { %35 = dma.hbm_to_vmem [thread:$0]  %s28_s16, 256, %s30_s20, [#allocation9], %s203_s17, %s203_s17, %s204_s18  }
   0x9   :  { %196 = dma.done.wait [#allocation6], 256  }
   0xa   :  { %197 = vsyncadd [#allocation6], 4294967040 }
   0xb   :  { %198 = dma.done.wait [#allocation9], 256  }
   0xc   :  { %199 = vsyncadd [#allocation9], 4294967040  ;;  %v51_v0 = vld [vmem:[#allocation5] sm:$0xff]  ;;  %v52_v1 = vld [vmem:[#allocation5 + $0x8] sm:$0xff]  ;;  %s113_s22 = sshll.u32 %s233_s2, 4  ;;  %s206_s25 = smov [#allocation10]   ;;  %s114_s22 = int_to_ptr.hbm [resolvable:$true] %s113_s22 }
   0xd   :  { %v53_v2 = vld [vmem:[#allocation8] sm:$0xff]  ;;  %v54_v3 = vld [vmem:[#allocation8 + $0x8] sm:$0xff]  ;;  %v62_v8 = vadd.f32 %v52_v1, %v51_v0 }
   0xe   :  { %v56_v4 = vmul.f32 %v53_v2, %v51_v0  ;;  %v57_v5 = vmul.f32 %v54_v3, %v52_v1  ;;  %v66_v6 = vadd.f32 %v54_v3, %v53_v2 }
  0x10   :  { %v58_v7 = vadd.f32 %v57_v5, %v56_v4  ;;  %97 = vadd.xlane.f32.xlu1 %v66_v6 }
  0x12   :  { %73 = vadd.xlane.f32.xlu0 %v58_v7 }
  0x1a   :  { %85 = vadd.xlane.f32.xlu0 %v62_v8 }
  0x83   :  { %v98_v9 = vpop.xlane.xlu1 %97 }
  0x84   :  { %v99_v11 = vrot.slane %v98_v9, 4 }
  0x85   :  { %v74_v10 = vpop.xlane.xlu0 %73 }
  0x86   :  { %v75_v12 = vrot.slane %v74_v10, 4  ;;  %v100_v14 = vadd.f32 %v99_v11, %v98_v9 }
  0x88   :  { %v76_v13 = vadd.f32 %v75_v12, %v74_v10  ;;  %v101_v17 = vrot.slane %v100_v14, 2 }
  0x8a   :  { %v77_v15 = vrot.slane %v76_v13, 2  ;;  %v102_v23 = vadd.f32 %v101_v17, %v100_v14 }
  0x8c   :  { %v78_v16 = vadd.f32 %v77_v15, %v76_v13  ;;  %v103_v26 = vrot.slane %v102_v23, 1 }
  0x8d   :  { %v86_v18 = vpop.xlane.xlu0 %85 }
  0x8e   :  { %v87_v19 = vrot.slane %v86_v18, 4  ;;  %v79_v20 = vrot.slane %v78_v16, 1  ;;  %v104_v29 = vadd.f32 %v103_v26, %v102_v23 }
  0x90   :  { %v88_v21 = vadd.f32 %v87_v19, %v86_v18  ;;  %v80_v22 = vadd.f32 %v79_v20, %v78_v16 }
  0x92   :  { %v89_v24 = vrot.slane %v88_v21, 2  ;;  %125 = vpush %v80_v22 }
  0x94   :  { %v90_v25 = vadd.f32 %v89_v24, %v88_v21 }
  0x96   :  { %v91_v27 = vrot.slane %v90_v25, 1 }
  0x98   :  { %v92_v28 = vadd.f32 %v91_v27, %v90_v25 }
  0x9a   :  { %127 = vpush %v92_v28 }
  0x9b   :  { %129 = vpush %v104_v29 }
  0xc3   :  { %s126_s0 = spop %125 }
  0xc4   :  { %83 = sst [smem:[#allocation10]] %s126_s0 }
  0xcb   :  { %s128_s23 = spop %127 }
  0xcc   :  { %95 = sst [smem:[#allocation10 + $0x1]] %s128_s23  ;;  %s130_s24 = spop %129 }
  0xcd   :  { %107 = sst [smem:[#allocation10 + $0x2]] %s130_s24 }
  0xce   :  { %116 = dma.smem_to_hbm %s206_s25, 16, %s114_s22, [#allocation7]  }
  0xcf   :  { %200 = dma.done.wait [#allocation7], 16  }
  0xd0   :  { %201 = vsyncadd [#allocation7], 4294967280 }
  0xd1   :  { %121 = sfence }
  0xd2   :  { %122 = vsyncpa [#allocation6], 1 }
  0xd3   :  { %123 = vsyncpa [#allocation9], 1 }
  0xd4   :  { %124 = vsyncpa [#allocation7], 1 }

</bundles_post_ra>
